<compile_context>
chip_gen: v6e
topology: v6e:2x2x1
jax: 0.10.0
libtpu: 0.0.40
codegen_flags: <defaults>
</compile_context>

<pallas_src>
import jax
import jax.numpy as jnp
from jax.experimental import pallas as pl
from jax.experimental.pallas import tpu as pltpu


def _round_up(x, m):
    return (x + m - 1) // m * m


def _make_focal_kernel(n_rows, tile_n, gamma, scale):
    """Build the per-tile kernel with static constants baked in.

    scale = alpha / N, so each tile emits its already-normalized partial sum.
    """

    def kernel(logits_ref, targets_ref, out_ref):
        # logits_ref : (tile_n, C) native dtype, VMEM
        # targets_ref: (tile_n, 1) int32, VMEM
        # out_ref    : (1, 1) f32, SMEM -- this tile's partial of the mean
        x = logits_ref[...].astype(jnp.float32)               # (tile_n, C)
        t = targets_ref[...]                                   # (tile_n, 1)

        # --- numerically-stable softmax pieces (exp(x-m) reused for pt) ---
        m = jnp.max(x, axis=-1, keepdims=True)                 # (tile_n, 1)
        e = jnp.exp(x - m)                                      # N*C EUP ops
        sum_e = jnp.sum(e, axis=-1, keepdims=True)              # (tile_n, 1)

        class_ids = jax.lax.broadcasted_iota(jnp.int32, x.shape, 1)
        is_tgt = class_ids == t
        tgt_logit = jnp.sum(jnp.where(is_tgt, x, 0.0),
                            axis=-1, keepdims=True)             # (tile_n, 1)
        e_tgt = jnp.sum(jnp.where(is_tgt, e, 0.0),
                        axis=-1, keepdims=True)                 # (tile_n, 1)

        # cross entropy per row (reduction='none'); clamp so pt <= 1 is sane.
        ce = jnp.maximum(jnp.log(sum_e) + m - tgt_logit, 0.0)

        # pt from the exponentials we already have: drops the second exp pass
        # (one reciprocal per row instead of one exp per row).
        pt = jnp.clip(e_tgt / sum_e, 0.0, 1.0)

        # --- focal weighting ---
        one_m_pt = 1.0 - pt
        if gamma == 2.0:
            w = one_m_pt * one_m_pt                              # VPU, exact
        elif gamma == 1.0:
            w = one_m_pt
        elif gamma == 0.0:
            w = jnp.ones_like(one_m_pt)
        else:
            w = jnp.power(one_m_pt, jnp.float32(gamma))
        focal = w * ce                                           # (tile_n, 1)

        # --- mask rows of the ragged last tile (also kills NaN/garbage from
        #     uninitialized VMEM in the padded region; keep this AFTER focal
        #     and BEFORE the sum) ---
        row_ids = (pl.program_id(0) * tile_n
                   + jax.lax.broadcasted_iota(jnp.int32, focal.shape, 0))
        focal = jnp.where(row_ids < n_rows, focal, 0.0)

        # --- per-tile partial of the mean (alpha/N folded in) ---
        out_ref[0, 0] = jnp.sum(focal) * jnp.float32(scale)

    return kernel


def focal_loss(logits, targets, gamma=2.0, alpha=1.0, block_vmem_bytes=8 << 20):
    """logits: (N, C) float (f32/bf16); targets: (N,) int class ids. Scalar f32.

    NOTE: out-of-range targets (e.g. ignore_index=-100) are not handled, same
    as the reference module which never passes them.
    """
    n, c = logits.shape
    targets2d = targets.astype(jnp.int32).reshape(n, 1)

    itemsize = jnp.dtype(logits.dtype).itemsize
    c_pad = _round_up(c, 128)
    # VMEM bytes one pipeline buffer holds per row: lane-padded logits row plus
    # the (tn, 1) int32 targets block, which pads to 128 lanes (512 B / row).
    per_row_vmem = c_pad * itemsize + 512
    # ~8 MiB per buffer -> ~16 MiB double-buffered inputs, well under the
    # 48 MiB scoped limit requested below (and under v7x's 64 MiB physical).
    rows_budget = max(8, (int(block_vmem_bytes) // per_row_vmem) // 8 * 8)

    tn = min(rows_budget, _round_up(n, 8))
    # Keep >= 2 grid steps whenever possible so the "parallel" axis can feed
    # both TensorCores on v7x (a single tile would idle one TC there).
    if n > 8:
        tn = min(tn, _round_up((n + 1) // 2, 8))
    tn = max(tn, 8)
    num_tiles = pl.cdiv(n, tn)

    # Small blocks (small C or small N): deepen pipelining to hide DMA jitter.
    block_bytes = tn * c_pad * itemsize
    logits_spec_kwargs = {}
    if num_tiles >= 4 and block_bytes < (1 << 20):
        logits_spec_kwargs["pipeline_mode"] = pl.Buffered(3)

    cost = pl.CostEstimate(
        flops=8 * n * c,
        transcendentals=n * c + 2 * n,
        bytes_accessed=n * c * itemsize + n * 4 + num_tiles * 4,
    )

    partials = pl.pallas_call(
        _make_focal_kernel(n, tn, float(gamma), float(alpha) / float(n)),
        out_shape=jax.ShapeDtypeStruct((num_tiles, 1), jnp.float32),
        grid=(num_tiles,),
        in_specs=[
            pl.BlockSpec((tn, c), lambda i: (i, 0), **logits_spec_kwargs),
            pl.BlockSpec((tn, 1), lambda i: (i, 0)),
        ],
        out_specs=pl.BlockSpec((1, 1), lambda i: (i, 0),
                               memory_space=pltpu.SMEM),
        compiler_params=pltpu.CompilerParams(
            dimension_semantics=("parallel",),
            vmem_limit_bytes=48 << 20,
        ),
        cost_estimate=cost,
    )(logits, targets2d)

    # alpha and 1/N already folded in-kernel; only the tiny final sum remains.
    return jnp.sum(partials)


def _focal_loss_ref(logits, targets, gamma=2.0, alpha=1.0):
    # Pure-JAX reference mirroring F.cross_entropy + focal weighting.
    logp = jax.nn.log_softmax(logits.astype(jnp.float32), axis=-1)
    ce = -jnp.take_along_axis(logp, targets[:, None].astype(jnp.int32),
                              axis=-1)[:, 0]
    pt = jnp.exp(-ce)
    return jnp.mean(alpha * (1.0 - pt) ** gamma * ce)


if __name__ == "__main__":
    key = jax.random.PRNGKey(0)
    k1, k2, k3, k4 = jax.random.split(key, 4)

    # Small case matching the module's typical use: batch of logits, 32 classes.
    N, C = 8, 32
    logits = jax.random.normal(k1, (N, C), dtype=jnp.float32)
    targets = jax.random.randint(k2, (N,), 0, C, dtype=jnp.int32)

    loss = jax.block_until_ready(focal_loss(logits, targets))
    ref = _focal_loss_ref(logits, targets)
    assert jnp.allclose(loss, ref, rtol=1e-5, atol=1e-6), (loss, ref)

    # bf16 input path (halved HBM traffic at scale).
    loss_bf16 = jax.block_until_ready(
        focal_loss(logits.astype(jnp.bfloat16), targets))
    ref_bf16 = _focal_loss_ref(logits.astype(jnp.bfloat16), targets)
    assert jnp.allclose(loss_bf16, ref_bf16, rtol=1e-2, atol=1e-2), (
        loss_bf16, ref_bf16)

    # Multi-tile + ragged last tile path (exercises the >=2-tile cap + mask).
    N2, C2 = 300, 160
    logits2 = jax.random.normal(k3, (N2, C2), dtype=jnp.float32)
    targets2 = jax.random.randint(k4, (N2,), 0, C2, dtype=jnp.int32)
    loss2 = jax.block_until_ready(focal_loss(logits2, targets2))
    ref2 = _focal_loss_ref(logits2, targets2)
    assert jnp.allclose(loss2, ref2, rtol=2e-5, atol=1e-6), (loss2, ref2)

    print("KERNEL_OK")
</pallas_src>

<mosaic_0001>
module attributes {stable_mosaic.version = 11 : i64} {
  func.func @kernel(%arg0: i32, %arg1: memref<8x32xf32, #tpu.memory_space<vmem>>, %arg2: memref<8x1xi32, #tpu.memory_space<vmem>>, %arg3: memref<1x1xf32, #tpu.memory_space<smem>>) attributes {dimension_semantics = [#tpu.dimension_semantics<parallel>], iteration_bounds = array<i64: 1>, scalar_prefetch = 0 : i64, scratch_operands = 0 : i64, tpu.core_type = #tpu.core_type<tc>, window_params = [{transform_indices = @transform_0, window_bounds = array<i64: 8, 32>}, {transform_indices = @transform_1, window_bounds = array<i64: 8, 1>}, {transform_indices = @transform_2, window_bounds = array<i64: 1, 1>}]} {
    %c0 = arith.constant 0 : index
    %c0_0 = arith.constant 0 : index
    %0 = vector.load %arg1[%c0, %c0_0] : memref<8x32xf32, #tpu.memory_space<vmem>>, vector<8x32xf32>
    %c0_1 = arith.constant 0 : index
    %c0_2 = arith.constant 0 : index
    %1 = vector.load %arg2[%c0_1, %c0_2] : memref<8x1xi32, #tpu.memory_space<vmem>>, vector<8x1xi32>
    %cst = arith.constant dense<0xFF800000> : vector<8xf32>
    %2 = vector.multi_reduction <maximumf>, %0, %cst [1] : vector<8x32xf32> to vector<8xf32>
    %3 = vector.shape_cast %2 : vector<8xf32> to vector<8x1xf32>
    %4 = vector.broadcast %3 : vector<8x1xf32> to vector<8x32xf32>
    %5 = arith.subf %0, %4 : vector<8x32xf32>
    %6 = math.exp %5 : vector<8x32xf32>
    %cst_3 = arith.constant dense<0.000000e+00> : vector<8xf32>
    %7 = vector.multi_reduction <add>, %6, %cst_3 [1] : vector<8x32xf32> to vector<8xf32>
    %8 = vector.shape_cast %7 : vector<8xf32> to vector<8x1xf32>
    %9 = tpu.iota {dimensions = array<i32: 1>} : vector<8x32xi32>
    %10 = vector.broadcast %1 : vector<8x1xi32> to vector<8x32xi32>
    %11 = arith.cmpi eq, %9, %10 : vector<8x32xi32>
    %cst_4 = arith.constant 0.000000e+00 : f32
    %12 = vector.broadcast %cst_4 : f32 to vector<8x32xf32>
    %13 = arith.select %11, %0, %12 : vector<8x32xi1>, vector<8x32xf32>
    %cst_5 = arith.constant dense<0.000000e+00> : vector<8xf32>
    %14 = vector.multi_reduction <add>, %13, %cst_5 [1] : vector<8x32xf32> to vector<8xf32>
    %15 = vector.shape_cast %14 : vector<8xf32> to vector<8x1xf32>
    %cst_6 = arith.constant 0.000000e+00 : f32
    %16 = vector.broadcast %cst_6 : f32 to vector<8x32xf32>
    %17 = arith.select %11, %6, %16 : vector<8x32xi1>, vector<8x32xf32>
    %cst_7 = arith.constant dense<0.000000e+00> : vector<8xf32>
    %18 = vector.multi_reduction <add>, %17, %cst_7 [1] : vector<8x32xf32> to vector<8xf32>
    %19 = vector.shape_cast %18 : vector<8xf32> to vector<8x1xf32>
    %20 = math.log %8 : vector<8x1xf32>
    %21 = arith.addf %20, %3 : vector<8x1xf32>
    %22 = arith.subf %21, %15 : vector<8x1xf32>
    %cst_8 = arith.constant 0.000000e+00 : f32
    %23 = vector.broadcast %cst_8 : f32 to vector<8x1xf32>
    %24 = arith.maximumf %22, %23 : vector<8x1xf32>
    %25 = arith.divf %19, %8 : vector<8x1xf32>
    %cst_9 = arith.constant 0.000000e+00 : f32
    %cst_10 = arith.constant 1.000000e+00 : f32
    %26 = vector.broadcast %cst_9 : f32 to vector<8x1xf32>
    %27 = arith.maximumf %26, %25 : vector<8x1xf32>
    %28 = vector.broadcast %cst_10 : f32 to vector<8x1xf32>
    %29 = arith.minimumf %28, %27 : vector<8x1xf32>
    %cst_11 = arith.constant 1.000000e+00 : f32
    %30 = vector.broadcast %cst_11 : f32 to vector<8x1xf32>
    %31 = arith.subf %30, %29 : vector<8x1xf32>
    %32 = arith.mulf %31, %31 : vector<8x1xf32>
    %33 = arith.mulf %32, %24 : vector<8x1xf32>
    %c8_i32 = arith.constant 8 : i32
    %34 = arith.muli %arg0, %c8_i32 : i32
    %35 = tpu.iota {dimensions = array<i32: 0>} : vector<8x1xi32>
    %36 = vector.broadcast %34 : i32 to vector<8x1xi32>
    %37 = arith.addi %36, %35 : vector<8x1xi32>
    %c8_i32_12 = arith.constant 8 : i32
    %38 = vector.broadcast %c8_i32_12 : i32 to vector<8x1xi32>
    %39 = arith.cmpi slt, %37, %38 : vector<8x1xi32>
    %cst_13 = arith.constant 0.000000e+00 : f32
    %40 = vector.broadcast %cst_13 : f32 to vector<8x1xf32>
    %41 = arith.select %39, %33, %40 : vector<8x1xi1>, vector<8x1xf32>
    %42 = vector.shape_cast %41 : vector<8x1xf32> to vector<1x8x1xf32>
    %cst_14 = arith.constant dense<0.000000e+00> : vector<1xf32>
    %43 = vector.multi_reduction <add>, %42, %cst_14 [1, 2] : vector<1x8x1xf32> to vector<1xf32>
    %44 = vector.shape_cast %43 : vector<1xf32> to vector<1x1x1xf32>
    %45 = vector.extract %44[0, 0, 0] : f32 from vector<1x1x1xf32>
    %cst_15 = arith.constant 1.250000e-01 : f32
    %46 = arith.mulf %45, %cst_15 : f32
    %c0_16 = arith.constant 0 : index
    %c0_17 = arith.constant 0 : index
    %47 = memref.load %arg3[%c0_16, %c0_17] : memref<1x1xf32, #tpu.memory_space<smem>>
    memref.store %46, %arg3[%c0_16, %c0_17] : memref<1x1xf32, #tpu.memory_space<smem>>
    return
  }
  func.func @transform_0(%arg0: i32) -> (i32, i32) {
    %c0_i32 = arith.constant 0 : i32
    %c0_i32_0 = arith.constant 0 : i32
    return %arg0, %c0_i32 : i32, i32
  }
  func.func @transform_1(%arg0: i32) -> (i32, i32) {
    %c0_i32 = arith.constant 0 : i32
    %c0_i32_0 = arith.constant 0 : i32
    return %arg0, %c0_i32 : i32, i32
  }
  func.func @transform_2(%arg0: i32) -> (i32, i32) {
    %c0_i32 = arith.constant 0 : i32
    %c0_i32_0 = arith.constant 0 : i32
    return %arg0, %c0_i32 : i32, i32
  }
}

</mosaic_0001>

<bundles_post_ra>
// kernel: tpu_custom_call.1
= control target key start
LH: loop header
LB: loop body
LE: loop exit
PB: predicated region body
PF: predicated region fallthrough
CT: control target
= control target key end

     0   :  { %vm14_vm0 = vcmask 261120   ;;  %s135_s0 = inlined_call_operand.vmem [shape: f32[8,32], index: 0, kind: input, shape index: {}]   ;;  %s136_s1 = inlined_call_operand.vmem [shape: s32[8,1], index: 1, kind: input, shape index: {}]   ;;  %s137_s2 = inlined_call_operand.hbm [shape: f32[1,1], index: 2, kind: output, shape index: {}]  }
   0x1   :  { %v12_v0 = vld [vmem:[%s135_s0] sm:$0xff] }
   0x2   :  { %7 = vsyncpa [#allocation3], 0  ;;  %v15_v1 = vsel %vm14_vm0, %v12_v0, -inf  ;;  %v105_v2 = vmov 0   ;;  %v13_v3 = vld [vmem:[%s136_s1] sm:$0xff]  ;;  %v24_v7 = vlaneseq  ;;  %vm57_vm2 = vcmask 7168  }
   0x3   :  { %88 = vset.pattern.permute.xlu0 %v105_v2  ;;  %s106_s13 = smov [#allocation2]  }
   0x4   :  { %16 = vmax.xlane.f32.xlu0 %v15_v1  ;;  %v25_v8 = vand.u32 127, %v24_v7 }
  0x1a   :  { %27 = vperm.xlu0 %88, %v13_v3  }
  0x8d   :  { %v17_v4 = vpop.xlane.xlu0 %16 }
  0x8e   :  { %v18_v5 = vsub.f32 %v12_v0, %v17_v4 }
  0x90   :  { %v19_v6 = vmul.f32 1.442695, %v18_v5 }
  0x92   :  { %89 = vpow2.f32 %v19_v6 }
  0x95   :  { %v28_v9 = vpop.permute.xlu0 %27 }
  0x96   :  { %vm29_vm1 = vcmp.eq.s32.totalorder %v25_v8, %v28_v9 }
  0x97   :  { %v30_v13 = vsel %vm29_vm1, %v12_v0, 0.0 }
  0x98   :  { %v31_v15 = vsel %vm14_vm0, %v30_v13, 0.0 }
  0x9f   :  { %v90_v10 = vpop.eup %89 }
  0xa0   :  { %v21_v11 = vsel %vm14_vm0, %v90_v10, 0.0  ;;  %v34_v12 = vsel %vm29_vm1, %v90_v10, 0.0 }
  0xa1   :  { %22 = vadd.xlane.f32.xlu1 %v21_v11  ;;  %v35_v14 = vsel %vm14_vm0, %v34_v12, 0.0 }
  0xa5   :  { %36 = vadd.xlane.f32.xlu1 %v35_v14 }
  0xa9   :  { %32 = vadd.xlane.f32.xlu1 %v31_v15 }
 0x12a   :  { %v23_v16 = vpop.xlane.xlu1 %22 }
 0x12b   :  { %91 = vlog2.f32 %v23_v16 }
 0x12c   :  { %93 = vrcp.f32 %v23_v16 }
 0x12e   :  { %v37_v19 = vpop.xlane.xlu1 %36 }
 0x132   :  { %v33_v24 = vpop.xlane.xlu1 %32 }
 0x138   :  { %v92_v17 = vpop.eup %91 }
 0x139   :  { %v94_v18 = vpop.eup %93  ;;  %v39_v20 = vmul.f32 0.6931472, %v92_v17 }
 0x13a   :  { %v44_v21 = vmul.f32 %v94_v18, %v37_v19 }
 0x13b   :  { %v40_v22 = vadd.f32 %v39_v20, %v17_v4 }
 0x13c   :  { %v45_v23 = vmax.f32 %v44_v21, 0.0 }
 0x13d   :  { %v41_v26 = vsub.f32 %v40_v22, %v33_v24 }
 0x13e   :  { %v46_v25 = vmin.f32 %v45_v23, 1.0 }
 0x13f   :  { %v42_v29 = vmax.f32 %v41_v26, 0.0 }
 0x140   :  { %v47_v27 = vsub.f32 1.0, %v46_v25 }
 0x142   :  { %v48_v28 = vmul.f32 %v47_v27, %v47_v27 }
 0x144   :  { %v49_v30 = vmul.f32 %v48_v28, %v42_v29 }
 0x146   :  { %v58_v31 = vsel %vm57_vm2, %v49_v30, 0.0 }
 0x147   :  { %59 = vadd.xlane.f32.xlu1 %v58_v31 }
 0x1d0   :  { %v60_v32 = vpop.xlane.xlu1 %59 }
 0x1d1   :  { %v61_v33 = vrot.slane %v60_v32, 4 }
 0x1d3   :  { %v62_v34 = vadd.f32 %v61_v33, %v60_v32 }
 0x1d5   :  { %v63_v35 = vrot.slane %v62_v34, 2 }
 0x1d7   :  { %v64_v36 = vadd.f32 %v63_v35, %v62_v34 }
 0x1d9   :  { %v65_v37 = vrot.slane %v64_v36, 1 }
 0x1db   :  { %v66_v38 = vadd.f32 %v65_v37, %v64_v36 }
 0x1dd   :  { %84 = vpush %v66_v38 }
 0x20e   :  { %s85_s0 = spop %84 }
 0x20f   :  { %s68_s1 = smul.f32 0.125, %s85_s0 }
 0x211   :  { %70 = sst [smem:[#allocation2]] %s68_s1 }
 0x212   :  { %78 = dma.smem_to_hbm %s106_s13, 16, %s137_s2, [#allocation3]  }
 0x213   :  { %103 = dma.done.wait [#allocation3], 16  }
 0x214   :  { %104 = vsyncadd [#allocation3], 4294967280 }
 0x215   :  { %82 = sfence }
 0x216   :  { %83 = vsyncpa [#allocation3], 1 }

</bundles_post_ra>
